<compile_context>
chip_gen: v6e
topology: v6e:2x2x1
jax: 0.10.0
libtpu: 0.0.40
codegen_flags: <defaults>
</compile_context>

<pallas_src>
import jax
import jax.numpy as jnp
from jax.experimental import pallas as pl
from jax.experimental.pallas import tpu as pltpu


def _round_up(v, m):
    return ((v + m - 1) // m) * m


# ---------------------------------------------------------------------------
# Kernel 1: streaming attention-gated segment aggregation.
# ---------------------------------------------------------------------------
def _make_agg_kernel(chunks_per_core, n_chunks_x, n_chunks_e, agg_dtype,
                     approx_sigmoid):
    f32 = jnp.float32

    def _sigmoid(s):
        # exp and the reciprocal both run on the EUP slot (VALU stays free).
        return pl.reciprocal(1.0 + jnp.exp(-s), approx=approx_sigmoid)

    def kernel(nb_ref, eb_ref, x_ref, e_ref, u_ref,
               wkx_ref, bkx_ref, wqx_ref, bqx_ref,
               wke_ref, bke_ref, wqe_ref, bqe_ref,
               xagg_ref, eagg_ref,
               px_ref, cx_ref, pe_ref, ce_ref):
        p = pl.program_id(0)
        j = pl.program_id(1)
        g = p * chunks_per_core + j          # global chunk index
        b_pad = u_ref.shape[0]

        @pl.when(j == 0)
        def _init():
            # Per-core partial accumulators live directly in the output blocks.
            xagg_ref[...] = jnp.zeros(xagg_ref.shape, xagg_ref.dtype)
            eagg_ref[...] = jnp.zeros(eagg_ref.shape, eagg_ref.dtype)
            # Key-fused resident queries:
            #   s[b,i] = q_b . (f_i @ Wk + bk) = (q_b @ Wk^T) . f_i + q_b . bk
            u = u_ref[...]
            qx = jnp.dot(u, wqx_ref[...], preferred_element_type=f32) + bqx_ref[...]
            qe = jnp.dot(u, wqe_ref[...], preferred_element_type=f32) + bqe_ref[...]
            px_ref[...] = jax.lax.dot_general(
                qx, wkx_ref[...], (((1,), (1,)), ((), ())),
                preferred_element_type=f32)                       # [B, f_x]
            pe_ref[...] = jax.lax.dot_general(
                qe, wke_ref[...], (((1,), (1,)), ((), ())),
                preferred_element_type=f32)                       # [B, f_e]
            cx_ref[...] = jnp.sum(qx * bkx_ref[...], axis=1, keepdims=True)
            ce_ref[...] = jnp.sum(qe * bke_ref[...], axis=1, keepdims=True)

        def accumulate(feat, ids, proj, const, acc_ref):
            # feat: [T, f]; ids: [1, T] int32; proj: [B, f]; const: [B, 1].
            t = feat.shape[0]
            feat_c = feat.astype(agg_dtype)
            s = jax.lax.dot_general(
                proj.astype(agg_dtype), feat_c, (((1,), (1,)), ((), ())),
                preferred_element_type=f32) + const               # [B, T]
            gid = jax.lax.broadcasted_iota(jnp.int32, (b_pad, t), 0)
            onehot = (gid == ids).astype(f32)                     # [B, T]
            # select-then-sigmoid: T transcendentals instead of B*T.
            s_sel = jnp.sum(onehot * s, axis=0, keepdims=True)    # [1, T]
            gate = onehot * _sigmoid(s_sel)                       # [B, T]
            acc_ref[0] += jnp.dot(gate.astype(agg_dtype), feat_c,
                                  preferred_element_type=f32)     # [B, f]

        @pl.when(g < n_chunks_x)
        def _nodes():
            accumulate(x_ref[...], nb_ref[0], px_ref[...], cx_ref[...], xagg_ref)

        @pl.when(g < n_chunks_e)
        def _edges():
            accumulate(e_ref[...], eb_ref[0], pe_ref[...], ce_ref[...], eagg_ref)

    return kernel


# ---------------------------------------------------------------------------
# Kernel 2: phi_u head (cross-core partial sum + Linear -> ReLU -> Linear).
# ---------------------------------------------------------------------------
def _head_kernel(xp_ref, ep_ref, u_ref, w1x_ref, w1e_ref, w1u_ref,
                 b1_ref, w2_ref, b2_ref, out_ref):
    f32 = jnp.float32
    n_part = xp_ref.shape[0]
    xagg = xp_ref[0]
    eagg = ep_ref[0]
    for c in range(1, n_part):               # static, tiny (num_cores partials)
        xagg = xagg + xp_ref[c]
        eagg = eagg + ep_ref[c]
    h1 = (jnp.dot(xagg, w1x_ref[...], preferred_element_type=f32)
          + jnp.dot(eagg, w1e_ref[...], preferred_element_type=f32)
          + jnp.dot(u_ref[...], w1u_ref[...], preferred_element_type=f32)
          + b1_ref[...])
    h1 = jnp.maximum(h1, 0.0)
    out_ref[...] = (jnp.dot(h1, w2_ref[...], preferred_element_type=f32)
                    + b2_ref[...]).astype(out_ref.dtype)


# ---------------------------------------------------------------------------
# Wrapper mirroring GlobalModel_A.forward.
# ---------------------------------------------------------------------------
def global_model_a(x, edge_index, e, u, batch, params, *,
                   tile_n=512, tile_e=512, num_cores=1,
                   agg_dtype=jnp.bfloat16, approx_sigmoid=True):
    """params = (wke, bke, wqe, bqe, wkx, bkx, wqx, bqx, w1, b1, w2, b2),
    Linear weights pre-transposed to [in, out].

    Tuning guidance: tile_n/tile_e 1024-2048 on v5e/v6e, 512-1024 on v7x
    (64 MiB VMEM); num_cores=2 on v7x (megacore), 1 on v5e/v6e;
    agg_dtype=float32 + approx_sigmoid=False for tight numerical parity.
    If a trace still shows exposed DMA after enlarging tiles, add
    pipeline_mode=pl.Buffered(3) to the x/e chunk BlockSpecs.
    """
    N, f_x = x.shape
    E, f_e = e.shape
    B, f_u = u.shape
    (wke, bke, wqe, bqe, wkx, bkx, wqx, bqx, w1, b1, w2, b2) = params
    hid = w1.shape[1]
    f_out = w2.shape[1]
    assert w1.shape[0] == f_x + f_e + f_u

    # ---- index glue (plain JAX) -------------------------------------------
    batch = batch.astype(jnp.int32)
    e_batch = batch[edge_index[0]]

    # ---- sublane / lane padding -------------------------------------------
    B_pad = _round_up(B, 8)                       # sublane-dense [B, T] tiles
    h_pad = _round_up(wkx.shape[1], 128)
    hid_pad = _round_up(hid, 128)
    fout_pad = _round_up(f_out, 128)

    u_p = jnp.pad(u, ((0, B_pad - B), (0, 0)))

    def pad_w(w, cols):
        return jnp.pad(w, ((0, 0), (0, cols - w.shape[1])))

    def pad_b(b, cols):
        return jnp.pad(b.reshape(1, -1), ((0, 0), (0, cols - b.shape[0])))

    wkx_p, bkx_p = pad_w(wkx, h_pad), pad_b(bkx, h_pad)
    wqx_p, bqx_p = pad_w(wqx, h_pad), pad_b(bqx, h_pad)
    wke_p, bke_p = pad_w(wke, h_pad), pad_b(bke, h_pad)
    wqe_p, bqe_p = pad_w(wqe, h_pad), pad_b(bqe, h_pad)

    # ---- chunking: node / edge streams are decoupled -----------------------
    tile_n = min(tile_n, _round_up(max(N, 1), 128))
    tile_e = min(tile_e, _round_up(max(E, 1), 128))
    C_x = max(1, pl.cdiv(N, tile_n))
    C_e = max(1, pl.cdiv(E, tile_e))
    P = max(1, int(num_cores))
    C_pc = pl.cdiv(max(C_x, C_e), P)

    x_p = jnp.pad(x, ((0, C_x * tile_n - N), (0, 0)))
    e_p = jnp.pad(e, ((0, C_e * tile_e - E), (0, 0)))
    nb = jnp.pad(batch, (0, C_x * tile_n - N)).reshape(C_x, 1, tile_n)
    eb = jnp.pad(e_batch, (0, C_e * tile_e - E)).reshape(C_e, 1, tile_e)

    def full(shape):
        return pl.BlockSpec(shape, lambda *_: (0,) * len(shape))

    def chunk_map(limit, trailing):
        # Clamp so the shorter stream re-presents its last block (no re-DMA);
        # compute on stale blocks is skipped in-kernel with pl.when.
        def idx(p, j):
            return (jnp.minimum(p * C_pc + j, limit - 1),) + (0,) * trailing
        return idx

    xagg_part, eagg_part = pl.pallas_call(
        _make_agg_kernel(C_pc, C_x, C_e, agg_dtype, approx_sigmoid),
        out_shape=(jax.ShapeDtypeStruct((P, B_pad, f_x), jnp.float32),
                   jax.ShapeDtypeStruct((P, B_pad, f_e), jnp.float32)),
        grid_spec=pltpu.PrefetchScalarGridSpec(
            num_scalar_prefetch=0,
            grid=(P, C_pc),
            in_specs=[
                pl.BlockSpec((1, 1, tile_n), chunk_map(C_x, 2)),  # node ids
                pl.BlockSpec((1, 1, tile_e), chunk_map(C_e, 2)),  # edge ids
                pl.BlockSpec((tile_n, f_x), chunk_map(C_x, 1)),   # x chunk
                pl.BlockSpec((tile_e, f_e), chunk_map(C_e, 1)),   # e chunk
                full((B_pad, f_u)),                               # u (resident)
                full(wkx_p.shape), full(bkx_p.shape),
                full(wqx_p.shape), full(bqx_p.shape),
                full(wke_p.shape), full(bke_p.shape),
                full(wqe_p.shape), full(bqe_p.shape),
            ],
            out_specs=[
                pl.BlockSpec((1, B_pad, f_x), lambda p, j: (p, 0, 0)),
                pl.BlockSpec((1, B_pad, f_e), lambda p, j: (p, 0, 0)),
            ],
            scratch_shapes=[
                pltpu.VMEM((B_pad, f_x), jnp.float32),   # Px = q_x @ Wkx^T
                pltpu.VMEM((B_pad, 1), jnp.float32),     # cx = q_x . bkx
                pltpu.VMEM((B_pad, f_e), jnp.float32),   # Pe = q_e @ Wke^T
                pltpu.VMEM((B_pad, 1), jnp.float32),     # ce = q_e . bke
            ]),
        compiler_params=pltpu.CompilerParams(
            dimension_semantics=("parallel", "arbitrary"),
            vmem_limit_bytes=32 * 1024 * 1024),
    )(nb, eb, x_p, e_p, u_p,
      wkx_p, bkx_p, wqx_p, bqx_p, wke_p, bke_p, wqe_p, bqe_p)

    # ---- phi_u head: separate tiny kernel, W1 split so no lane concat ------
    w1x = pad_w(w1[:f_x], hid_pad)
    w1e = pad_w(w1[f_x:f_x + f_e], hid_pad)
    w1u = pad_w(w1[f_x + f_e:], hid_pad)
    b1p = pad_b(b1, hid_pad)
    w2p = jnp.pad(w2, ((0, hid_pad - hid), (0, fout_pad - f_out)))
    b2p = pad_b(b2, fout_pad)

    out_padded = pl.pallas_call(
        _head_kernel,
        out_shape=jax.ShapeDtypeStruct((B_pad, fout_pad), jnp.float32),
        grid_spec=pltpu.PrefetchScalarGridSpec(
            num_scalar_prefetch=0,
            grid=(1,),
            in_specs=[full(tuple(xagg_part.shape)), full(tuple(eagg_part.shape)),
                      full(tuple(u_p.shape)),
                      full(tuple(w1x.shape)), full(tuple(w1e.shape)),
                      full(tuple(w1u.shape)), full(tuple(b1p.shape)),
                      full(tuple(w2p.shape)), full(tuple(b2p.shape))],
            out_specs=full((B_pad, fout_pad))),
    )(xagg_part, eagg_part, u_p, w1x, w1e, w1u, b1p, w2p, b2p)

    return out_padded[:B, :f_out]


# ---------------------------------------------------------------------------
# Pure-JAX reference matching the PyTorch forward.
# ---------------------------------------------------------------------------
def _reference(x, edge_index, e, u, batch, params):
    B = u.shape[0]
    (wke, bke, wqe, bqe, wkx, bkx, wqx, bqx, w1, b1, w2, b2) = params
    src = edge_index[0]
    e_batch = batch[src]

    k_e = e @ wke + bke
    q_e = (u @ wqe + bqe)[e_batch]
    a_e = jax.nn.sigmoid(jnp.sum(k_e * q_e, axis=1, keepdims=True))
    e_agg = jax.ops.segment_sum(a_e * e, e_batch, num_segments=B)

    k_x = x @ wkx + bkx
    q_x = (u @ wqx + bqx)[batch]
    a_x = jax.nn.sigmoid(jnp.sum(k_x * q_x, axis=1, keepdims=True))
    x_agg = jax.ops.segment_sum(a_x * x, batch, num_segments=B)

    out = jnp.concatenate([x_agg, e_agg, u], axis=1)
    h1 = jnp.maximum(out @ w1 + b1, 0.0)
    return h1 @ w2 + b2


if __name__ == "__main__":
    # Small synthetic problem; E >> N so the decoupled node/edge streams and
    # the chunked accumulation path are exercised.
    B, N, E = 4, 384, 1024
    f_x, f_e, f_u, h = 16, 16, 32, 32
    f_out = f_u                      # f_u_out defaults to f_u
    f_in = f_x + f_e + f_u

    key = jax.random.PRNGKey(0)
    ks = jax.random.split(key, 18)

    x = jax.random.normal(ks[0], (N, f_x), dtype=jnp.float32)
    e = jax.random.normal(ks[1], (E, f_e), dtype=jnp.float32)
    u = jax.random.normal(ks[2], (B, f_u), dtype=jnp.float32)
    src = jax.random.randint(ks[3], (E,), 0, N, dtype=jnp.int32)
    dst = jax.random.randint(ks[4], (E,), 0, N, dtype=jnp.int32)
    edge_index = jnp.stack([src, dst], axis=0)                    # [2, E]
    batch = jnp.repeat(jnp.arange(B, dtype=jnp.int32), N // B)    # node -> graph

    def uinit(k, shape, fan_in):
        lim = 1.0 / jnp.sqrt(jnp.float32(fan_in))
        return jax.random.uniform(k, shape, jnp.float32, -lim, lim)

    # PyTorch-like Linear init, stored pre-transposed as [in, out].
    wke = uinit(ks[5], (f_e, h), f_e);   bke = uinit(ks[6], (h,), f_e)
    wqe = uinit(ks[7], (f_u, h), f_u);   bqe = uinit(ks[8], (h,), f_u)
    wkx = uinit(ks[9], (f_x, h), f_x);   bkx = uinit(ks[10], (h,), f_x)
    wqx = uinit(ks[11], (f_u, h), f_u);  bqx = uinit(ks[12], (h,), f_u)
    # TODO(synk): phi_u = model_fn(f_e+f_x+f_u, f_u_out) is user-provided;
    # instantiated here as Sequential(Linear(f_in, f_out), ReLU(), Linear(f_out, f_out)).
    w1 = uinit(ks[13], (f_in, f_out), f_in);   b1 = uinit(ks[14], (f_out,), f_in)
    w2 = uinit(ks[15], (f_out, f_out), f_out); b2 = uinit(ks[16], (f_out,), f_out)
    params = (wke, bke, wqe, bqe, wkx, bkx, wqx, bqx, w1, b1, w2, b2)

    ref = _reference(x, edge_index, e, u, batch, params)

    # 1) Tight-parity path: f32 MXU operands, exact sigmoid, small tiles so the
    #    multi-chunk accumulators, the decoupled streams (C_x=3 != C_e=4) and
    #    the 2-way "parallel" grid axis (megacore path) are all exercised.
    out_f32 = global_model_a(x, edge_index, e, u, batch, params,
                             tile_n=128, tile_e=256, num_cores=2,
                             agg_dtype=jnp.float32, approx_sigmoid=False)
    out_f32 = jax.block_until_ready(out_f32)
    assert out_f32.shape == (B, f_out)
    assert jnp.allclose(out_f32, ref, atol=5e-4, rtol=5e-4), "f32 mismatch vs reference"

    # 2) Default performance path: large tiles, bf16 MXU operands with f32
    #    accumulation (elementwise math stays f32), approx EUP reciprocal.
    out_def = global_model_a(x, edge_index, e, u, batch, params)
    out_def = jax.block_until_ready(out_def)
    assert out_def.shape == (B, f_out)
    assert bool(jnp.all(jnp.isfinite(out_def)))
    assert jnp.allclose(out_def, ref, atol=1.5e-1, rtol=1.5e-1), "bf16 path diverged"

    print("KERNEL_OK")
</pallas_src>

<mosaic_0001>
module attributes {stable_mosaic.version = 11 : i64} {
  func.func @kernel(%arg0: i32, %arg1: i32, %arg2: memref<1x1x128xi32, #tpu.memory_space<vmem>>, %arg3: memref<1x1x256xi32, #tpu.memory_space<vmem>>, %arg4: memref<128x16xf32, #tpu.memory_space<vmem>>, %arg5: memref<256x16xf32, #tpu.memory_space<vmem>>, %arg6: memref<8x32xf32, #tpu.memory_space<vmem>>, %arg7: memref<16x128xf32, #tpu.memory_space<vmem>>, %arg8: memref<1x128xf32, #tpu.memory_space<vmem>>, %arg9: memref<32x128xf32, #tpu.memory_space<vmem>>, %arg10: memref<1x128xf32, #tpu.memory_space<vmem>>, %arg11: memref<16x128xf32, #tpu.memory_space<vmem>>, %arg12: memref<1x128xf32, #tpu.memory_space<vmem>>, %arg13: memref<32x128xf32, #tpu.memory_space<vmem>>, %arg14: memref<1x128xf32, #tpu.memory_space<vmem>>, %arg15: memref<1x8x16xf32, #tpu.memory_space<vmem>>, %arg16: memref<1x8x16xf32, #tpu.memory_space<vmem>>, %arg17: memref<8x16xf32, #tpu.memory_space<vmem>>, %arg18: memref<8x1xf32, #tpu.memory_space<vmem>>, %arg19: memref<8x16xf32, #tpu.memory_space<vmem>>, %arg20: memref<8x1xf32, #tpu.memory_space<vmem>>) attributes {dimension_semantics = [#tpu.dimension_semantics<parallel>, #tpu.dimension_semantics<arbitrary>], iteration_bounds = array<i64: 2, 2>, scalar_prefetch = 0 : i64, scratch_operands = 4 : i64, tpu.core_type = #tpu.core_type<tc>, window_params = [{transform_indices = @transform_0, window_bounds = array<i64: 1, 1, 128>}, {transform_indices = @transform_1, window_bounds = array<i64: 1, 1, 256>}, {transform_indices = @transform_2, window_bounds = array<i64: 128, 16>}, {transform_indices = @transform_3, window_bounds = array<i64: 256, 16>}, {pipeline_mode = #tpu.pipeline_mode<synchronous>, transform_indices = @transform_4, window_bounds = array<i64: 8, 32>}, {pipeline_mode = #tpu.pipeline_mode<synchronous>, transform_indices = @transform_5, window_bounds = array<i64: 16, 128>}, {pipeline_mode = #tpu.pipeline_mode<synchronous>, transform_indices = @transform_6, window_bounds = array<i64: 1, 128>}, {pipeline_mode = #tpu.pipeline_mode<synchronous>, transform_indices = @transform_7, window_bounds = array<i64: 32, 128>}, {pipeline_mode = #tpu.pipeline_mode<synchronous>, transform_indices = @transform_8, window_bounds = array<i64: 1, 128>}, {pipeline_mode = #tpu.pipeline_mode<synchronous>, transform_indices = @transform_9, window_bounds = array<i64: 16, 128>}, {pipeline_mode = #tpu.pipeline_mode<synchronous>, transform_indices = @transform_10, window_bounds = array<i64: 1, 128>}, {pipeline_mode = #tpu.pipeline_mode<synchronous>, transform_indices = @transform_11, window_bounds = array<i64: 32, 128>}, {pipeline_mode = #tpu.pipeline_mode<synchronous>, transform_indices = @transform_12, window_bounds = array<i64: 1, 128>}, {transform_indices = @transform_13, window_bounds = array<i64: 1, 8, 16>}, {transform_indices = @transform_14, window_bounds = array<i64: 1, 8, 16>}]} {
    %c2_i32 = arith.constant 2 : i32
    %0 = arith.muli %arg0, %c2_i32 : i32
    %1 = arith.addi %0, %arg1 : i32
    %c0_i32 = arith.constant 0 : i32
    %2 = arith.cmpi eq, %arg1, %c0_i32 : i32
    %3 = arith.extui %2 : i1 to i32
    %c0_i32_0 = arith.constant 0 : i32
    %4 = arith.cmpi ne, %3, %c0_i32_0 : i32
    scf.if %4 {
      %cst = arith.constant 0.000000e+00 : f32
      %11 = vector.broadcast %cst : f32 to vector<1x8x16xf32>
      %c0 = arith.constant 0 : index
      %c0_3 = arith.constant 0 : index
      %c0_4 = arith.constant 0 : index
      %12 = vector.load %arg15[%c0, %c0_3, %c0_4] : memref<1x8x16xf32, #tpu.memory_space<vmem>>, vector<1x8x16xf32>
      tpu.vector_store %arg15[%c0, %c0_3, %c0_4], %11 {strides = array<i32>} : memref<1x8x16xf32, #tpu.memory_space<vmem>>, vector<1x8x16xf32>,
      %cst_5 = arith.constant 0.000000e+00 : f32
      %13 = vector.broadcast %cst_5 : f32 to vector<1x8x16xf32>
      %c0_6 = arith.constant 0 : index
      %c0_7 = arith.constant 0 : index
      %c0_8 = arith.constant 0 : index
      %14 = vector.load %arg16[%c0_6, %c0_7, %c0_8] : memref<1x8x16xf32, #tpu.memory_space<vmem>>, vector<1x8x16xf32>
      tpu.vector_store %arg16[%c0_6, %c0_7, %c0_8], %13 {strides = array<i32>} : memref<1x8x16xf32, #tpu.memory_space<vmem>>, vector<1x8x16xf32>,
      %c0_9 = arith.constant 0 : index
      %c0_10 = arith.constant 0 : index
      %15 = vector.load %arg6[%c0_9, %c0_10] : memref<8x32xf32, #tpu.memory_space<vmem>>, vector<8x32xf32>
      %c0_11 = arith.constant 0 : index
      %c0_12 = arith.constant 0 : index
      %16 = vector.load %arg9[%c0_11, %c0_12] : memref<32x128xf32, #tpu.memory_space<vmem>>, vector<32x128xf32>
      %cst_13 = arith.constant dense<0.000000e+00> : vector<8x128xf32>
      %17 = tpu.matmul %15, %16, %cst_13 {dimension_numbers = #tpu.dot_dimension_numbers<[1], [0], [0], [1], [0, 0, 1, 1], [], []>} : vector<8x32xf32>, vector<32x128xf32>, vector<8x128xf32> -> vector<8x128xf32>
      %c0_14 = arith.constant 0 : index
      %c0_15 = arith.constant 0 : index
      %18 = vector.load %arg10[%c0_14, %c0_15] : memref<1x128xf32, #tpu.memory_space<vmem>>, vector<1x128xf32>
      %19 = vector.broadcast %18 : vector<1x128xf32> to vector<8x128xf32>
      %20 = arith.addf %17, %19 : vector<8x128xf32>
      %c0_16 = arith.constant 0 : index
      %c0_17 = arith.constant 0 : index
      %21 = vector.load %arg13[%c0_16, %c0_17] : memref<32x128xf32, #tpu.memory_space<vmem>>, vector<32x128xf32>
      %cst_18 = arith.constant dense<0.000000e+00> : vector<8x128xf32>
      %22 = tpu.matmul %15, %21, %cst_18 {dimension_numbers = #tpu.dot_dimension_numbers<[1], [0], [0], [1], [0, 0, 1, 1], [], []>} : vector<8x32xf32>, vector<32x128xf32>, vector<8x128xf32> -> vector<8x128xf32>
      %c0_19 = arith.constant 0 : index
      %c0_20 = arith.constant 0 : index
      %23 = vector.load %arg14[%c0_19, %c0_20] : memref<1x128xf32, #tpu.memory_space<vmem>>, vector<1x128xf32>
      %24 = vector.broadcast %23 : vector<1x128xf32> to vector<8x128xf32>
      %25 = arith.addf %22, %24 : vector<8x128xf32>
      %c0_21 = arith.constant 0 : index
      %c0_22 = arith.constant 0 : index
      %26 = vector.load %arg7[%c0_21, %c0_22] : memref<16x128xf32, #tpu.memory_space<vmem>>, vector<16x128xf32>
      %cst_23 = arith.constant dense<0.000000e+00> : vector<8x16xf32>
      %27 = tpu.matmul %20, %26, %cst_23 {dimension_numbers = #tpu.dot_dimension_numbers<[1], [1], [0], [0], [0, 0, 1, 0], [], []>} : vector<8x128xf32>, vector<16x128xf32>, vector<8x16xf32> -> vector<8x16xf32>
      %c0_24 = arith.constant 0 : index
      %c0_25 = arith.constant 0 : index
      %28 = vector.load %arg17[%c0_24, %c0_25] : memref<8x16xf32, #tpu.memory_space<vmem>>, vector<8x16xf32>
      tpu.vector_store %arg17[%c0_24, %c0_25], %27 {strides = array<i32>} : memref<8x16xf32, #tpu.memory_space<vmem>>, vector<8x16xf32>,
      %c0_26 = arith.constant 0 : index
      %c0_27 = arith.constant 0 : index
      %29 = vector.load %arg11[%c0_26, %c0_27] : memref<16x128xf32, #tpu.memory_space<vmem>>, vector<16x128xf32>
      %cst_28 = arith.constant dense<0.000000e+00> : vector<8x16xf32>
      %30 = tpu.matmul %25, %29, %cst_28 {dimension_numbers = #tpu.dot_dimension_numbers<[1], [1], [0], [0], [0, 0, 1, 0], [], []>} : vector<8x128xf32>, vector<16x128xf32>, vector<8x16xf32> -> vector<8x16xf32>
      %c0_29 = arith.constant 0 : index
      %c0_30 = arith.constant 0 : index
      %31 = vector.load %arg19[%c0_29, %c0_30] : memref<8x16xf32, #tpu.memory_space<vmem>>, vector<8x16xf32>
      tpu.vector_store %arg19[%c0_29, %c0_30], %30 {strides = array<i32>} : memref<8x16xf32, #tpu.memory_space<vmem>>, vector<8x16xf32>,
      %c0_31 = arith.constant 0 : index
      %c0_32 = arith.constant 0 : index
      %32 = vector.load %arg8[%c0_31, %c0_32] : memref<1x128xf32, #tpu.memory_space<vmem>>, vector<1x128xf32>
      %33 = vector.broadcast %32 : vector<1x128xf32> to vector<8x128xf32>
      %34 = arith.mulf %20, %33 : vector<8x128xf32>
      %cst_33 = arith.constant dense<0.000000e+00> : vector<8xf32>
      %35 = vector.multi_reduction <add>, %34, %cst_33 [1] : vector<8x128xf32> to vector<8xf32>
      %36 = vector.shape_cast %35 : vector<8xf32> to vector<8x1xf32>
      %c0_34 = arith.constant 0 : index
      %c0_35 = arith.constant 0 : index
      %37 = vector.load %arg18[%c0_34, %c0_35] : memref<8x1xf32, #tpu.memory_space<vmem>>, vector<8x1xf32>
      tpu.vector_store %arg18[%c0_34, %c0_35], %36 {strides = array<i32>} : memref<8x1xf32, #tpu.memory_space<vmem>>, vector<8x1xf32>,
      %c0_36 = arith.constant 0 : index
      %c0_37 = arith.constant 0 : index
      %38 = vector.load %arg12[%c0_36, %c0_37] : memref<1x128xf32, #tpu.memory_space<vmem>>, vector<1x128xf32>
      %39 = vector.broadcast %38 : vector<1x128xf32> to vector<8x128xf32>
      %40 = arith.mulf %25, %39 : vector<8x128xf32>
      %cst_38 = arith.constant dense<0.000000e+00> : vector<8xf32>
      %41 = vector.multi_reduction <add>, %40, %cst_38 [1] : vector<8x128xf32> to vector<8xf32>
      %42 = vector.shape_cast %41 : vector<8xf32> to vector<8x1xf32>
      %c0_39 = arith.constant 0 : index
      %c0_40 = arith.constant 0 : index
      %43 = vector.load %arg20[%c0_39, %c0_40] : memref<8x1xf32, #tpu.memory_space<vmem>>, vector<8x1xf32>
      tpu.vector_store %arg20[%c0_39, %c0_40], %42 {strides = array<i32>} : memref<8x1xf32, #tpu.memory_space<vmem>>, vector<8x1xf32>,
    } else {
    }
    %c3_i32 = arith.constant 3 : i32
    %5 = arith.cmpi slt, %1, %c3_i32 : i32
    %6 = arith.extui %5 : i1 to i32
    %c0_i32_1 = arith.constant 0 : i32
    %7 = arith.cmpi ne, %6, %c0_i32_1 : i32
    scf.if %7 {
      %c0 = arith.constant 0 : index
      %c0_3 = arith.constant 0 : index
      %11 = vector.load %arg4[%c0, %c0_3] : memref<128x16xf32, #tpu.memory_space<vmem>>, vector<128x16xf32>
      %c0_4 = arith.constant 0 : index
      %c0_5 = arith.constant 0 : index
      %c0_6 = arith.constant 0 : index
      %12 = vector.load %arg2[%c0_4, %c0_5, %c0_6] : memref<1x1x128xi32, #tpu.memory_space<vmem>>, vector<1x1x128xi32>
      %13 = vector.shape_cast %12 : vector<1x1x128xi32> to vector<1x128xi32>
      %c0_7 = arith.constant 0 : index
      %c0_8 = arith.constant 0 : index
      %14 = vector.load %arg17[%c0_7, %c0_8] : memref<8x16xf32, #tpu.memory_space<vmem>>, vector<8x16xf32>
      %c0_9 = arith.constant 0 : index
      %c0_10 = arith.constant 0 : index
      %15 = vector.load %arg18[%c0_9, %c0_10] : memref<8x1xf32, #tpu.memory_space<vmem>>, vector<8x1xf32>
      %cst = arith.constant dense<0.000000e+00> : vector<8x128xf32>
      %16 = tpu.matmul %14, %11, %cst {dimension_numbers = #tpu.dot_dimension_numbers<[1], [1], [0], [0], [0, 0, 1, 0], [], []>} : vector<8x16xf32>, vector<128x16xf32>, vector<8x128xf32> -> vector<8x128xf32>
      %17 = vector.broadcast %15 : vector<8x1xf32> to vector<8x128xf32>
      %18 = arith.addf %16, %17 : vector<8x128xf32>
      %19 = tpu.iota {dimensions = array<i32: 0>} : vector<8x128xi32>
      %20 = vector.broadcast %13 : vector<1x128xi32> to vector<8x128xi32>
      %21 = arith.cmpi eq, %19, %20 : vector<8x128xi32>
      %22 = arith.extui %21 : vector<8x128xi1> to vector<8x128xi32>
      %23 = arith.sitofp %22 : vector<8x128xi32> to vector<8x128xf32>
      %24 = arith.mulf %23, %18 : vector<8x128xf32>
      %cst_11 = arith.constant dense<0.000000e+00> : vector<128xf32>
      %25 = vector.multi_reduction <add>, %24, %cst_11 [0] : vector<8x128xf32> to vector<128xf32>
      %26 = vector.shape_cast %25 : vector<128xf32> to vector<1x128xf32>
      %cst_12 = arith.constant 0.000000e+00 : f32
      %27 = vector.broadcast %cst_12 : f32 to vector<1x128xf32>
      %28 = arith.subf %27, %26 : vector<1x128xf32>
      %29 = math.exp %28 : vector<1x128xf32>
      %cst_13 = arith.constant 1.000000e+00 : f32
      %30 = vector.broadcast %cst_13 : f32 to vector<1x128xf32>
      %31 = arith.addf %30, %29 : vector<1x128xf32>
      %32 = tpu.reciprocal %31 : vector<1x128xf32> -> vector<1x128xf32>
      %33 = vector.broadcast %32 : vector<1x128xf32> to vector<8x128xf32>
      %34 = arith.mulf %23, %33 : vector<8x128xf32>
      %c0_14 = arith.constant 0 : index
      %c0_15 = arith.constant 0 : index
      %c0_16 = arith.constant 0 : index
      %35 = vector.load %arg15[%c0_14, %c0_15, %c0_16] : memref<1x8x16xf32, #tpu.memory_space<vmem>>, vector<1x8x16xf32>
      %36 = vector.shape_cast %35 : vector<1x8x16xf32> to vector<8x16xf32>
      %cst_17 = arith.constant dense<0.000000e+00> : vector<8x16xf32>
      %37 = tpu.matmul %34, %11, %cst_17 {dimension_numbers = #tpu.dot_dimension_numbers<[1], [0], [0], [1], [0, 0, 1, 1], [], []>} : vector<8x128xf32>, vector<128x16xf32>, vector<8x16xf32> -> vector<8x16xf32>
      %38 = arith.addf %36, %37 : vector<8x16xf32>
      %c0_18 = arith.constant 0 : index
      %c0_19 = arith.constant 0 : index
      %c0_20 = arith.constant 0 : index
      %39 = vector.load %arg15[%c0_18, %c0_19, %c0_20] : memref<1x8x16xf32, #tpu.memory_space<vmem>>, vector<1x8x16xf32>
      %40 = vector.shape_cast %39 : vector<1x8x16xf32> to vector<8x16xf32>
      %41 = vector.shape_cast %38 : vector<8x16xf32> to vector<1x8x16xf32>
      tpu.vector_store %arg15[%c0_18, %c0_19, %c0_20], %41 {strides = array<i32>} : memref<1x8x16xf32, #tpu.memory_space<vmem>>, vector<1x8x16xf32>,
    } else {
    }
    %c4_i32 = arith.constant 4 : i32
    %8 = arith.cmpi slt, %1, %c4_i32 : i32
    %9 = arith.extui %8 : i1 to i32
    %c0_i32_2 = arith.constant 0 : i32
    %10 = arith.cmpi ne, %9, %c0_i32_2 : i32
    scf.if %10 {
      %c0 = arith.constant 0 : index
      %c0_3 = arith.constant 0 : index
      %11 = vector.load %arg5[%c0, %c0_3] : memref<256x16xf32, #tpu.memory_space<vmem>>, vector<256x16xf32>
      %c0_4 = arith.constant 0 : index
      %c0_5 = arith.constant 0 : index
      %c0_6 = arith.constant 0 : index
      %12 = vector.load %arg3[%c0_4, %c0_5, %c0_6] : memref<1x1x256xi32, #tpu.memory_space<vmem>>, vector<1x1x256xi32>
      %13 = vector.shape_cast %12 : vector<1x1x256xi32> to vector<1x256xi32>
      %c0_7 = arith.constant 0 : index
      %c0_8 = arith.constant 0 : index
      %14 = vector.load %arg19[%c0_7, %c0_8] : memref<8x16xf32, #tpu.memory_space<vmem>>, vector<8x16xf32>
      %c0_9 = arith.constant 0 : index
      %c0_10 = arith.constant 0 : index
      %15 = vector.load %arg20[%c0_9, %c0_10] : memref<8x1xf32, #tpu.memory_space<vmem>>, vector<8x1xf32>
      %cst = arith.constant dense<0.000000e+00> : vector<8x256xf32>
      %16 = tpu.matmul %14, %11, %cst {dimension_numbers = #tpu.dot_dimension_numbers<[1], [1], [0], [0], [0, 0, 1, 0], [], []>} : vector<8x16xf32>, vector<256x16xf32>, vector<8x256xf32> -> vector<8x256xf32>
      %17 = vector.broadcast %15 : vector<8x1xf32> to vector<8x256xf32>
      %18 = arith.addf %16, %17 : vector<8x256xf32>
      %19 = tpu.iota {dimensions = array<i32: 0>} : vector<8x256xi32>
      %20 = vector.broadcast %13 : vector<1x256xi32> to vector<8x256xi32>
      %21 = arith.cmpi eq, %19, %20 : vector<8x256xi32>
      %22 = arith.extui %21 : vector<8x256xi1> to vector<8x256xi32>
      %23 = arith.sitofp %22 : vector<8x256xi32> to vector<8x256xf32>
      %24 = arith.mulf %23, %18 : vector<8x256xf32>
      %cst_11 = arith.constant dense<0.000000e+00> : vector<256xf32>
      %25 = vector.multi_reduction <add>, %24, %cst_11 [0] : vector<8x256xf32> to vector<256xf32>
      %26 = vector.shape_cast %25 : vector<256xf32> to vector<1x256xf32>
      %cst_12 = arith.constant 0.000000e+00 : f32
      %27 = vector.broadcast %cst_12 : f32 to vector<1x256xf32>
      %28 = arith.subf %27, %26 : vector<1x256xf32>
      %29 = math.exp %28 : vector<1x256xf32>
      %cst_13 = arith.constant 1.000000e+00 : f32
      %30 = vector.broadcast %cst_13 : f32 to vector<1x256xf32>
      %31 = arith.addf %30, %29 : vector<1x256xf32>
      %32 = tpu.reciprocal %31 : vector<1x256xf32> -> vector<1x256xf32>
      %33 = vector.broadcast %32 : vector<1x256xf32> to vector<8x256xf32>
      %34 = arith.mulf %23, %33 : vector<8x256xf32>
      %c0_14 = arith.constant 0 : index
      %c0_15 = arith.constant 0 : index
      %c0_16 = arith.constant 0 : index
      %35 = vector.load %arg16[%c0_14, %c0_15, %c0_16] : memref<1x8x16xf32, #tpu.memory_space<vmem>>, vector<1x8x16xf32>
      %36 = vector.shape_cast %35 : vector<1x8x16xf32> to vector<8x16xf32>
      %cst_17 = arith.constant dense<0.000000e+00> : vector<8x16xf32>
      %37 = tpu.matmul %34, %11, %cst_17 {dimension_numbers = #tpu.dot_dimension_numbers<[1], [0], [0], [1], [0, 0, 1, 1], [], []>} : vector<8x256xf32>, vector<256x16xf32>, vector<8x16xf32> -> vector<8x16xf32>
      %38 = arith.addf %36, %37 : vector<8x16xf32>
      %c0_18 = arith.constant 0 : index
      %c0_19 = arith.constant 0 : index
      %c0_20 = arith.constant 0 : index
      %39 = vector.load %arg16[%c0_18, %c0_19, %c0_20] : memref<1x8x16xf32, #tpu.memory_space<vmem>>, vector<1x8x16xf32>
      %40 = vector.shape_cast %39 : vector<1x8x16xf32> to vector<8x16xf32>
      %41 = vector.shape_cast %38 : vector<8x16xf32> to vector<1x8x16xf32>
      tpu.vector_store %arg16[%c0_18, %c0_19, %c0_20], %41 {strides = array<i32>} : memref<1x8x16xf32, #tpu.memory_space<vmem>>, vector<1x8x16xf32>,
    } else {
    }
    return
  }
  func.func @transform_0(%arg0: i32, %arg1: i32) -> (i32, i32, i32) {
    %c2_i32 = arith.constant 2 : i32
    %0 = arith.muli %arg0, %c2_i32 : i32
    %1 = arith.addi %0, %arg1 : i32
    %c2_i32_0 = arith.constant 2 : i32
    %2 = arith.minsi %1, %c2_i32_0 : i32
    %c0_i32 = arith.constant 0 : i32
    %c0_i32_1 = arith.constant 0 : i32
    %c0_i32_2 = arith.constant 0 : i32
    return %2, %c0_i32, %c0_i32_1 : i32, i32, i32
  }
  func.func @transform_1(%arg0: i32, %arg1: i32) -> (i32, i32, i32) {
    %c2_i32 = arith.constant 2 : i32
    %0 = arith.muli %arg0, %c2_i32 : i32
    %1 = arith.addi %0, %arg1 : i32
    %c3_i32 = arith.constant 3 : i32
    %2 = arith.minsi %1, %c3_i32 : i32
    %c0_i32 = arith.constant 0 : i32
    %c0_i32_0 = arith.constant 0 : i32
    %c0_i32_1 = arith.constant 0 : i32
    return %2, %c0_i32, %c0_i32_0 : i32, i32, i32
  }
  func.func @transform_2(%arg0: i32, %arg1: i32) -> (i32, i32) {
    %c2_i32 = arith.constant 2 : i32
    %0 = arith.muli %arg0, %c2_i32 : i32
    %1 = arith.addi %0, %arg1 : i32
    %c2_i32_0 = arith.constant 2 : i32
    %2 = arith.minsi %1, %c2_i32_0 : i32
    %c0_i32 = arith.constant 0 : i32
    %c0_i32_1 = arith.constant 0 : i32
    return %2, %c0_i32 : i32, i32
  }
  func.func @transform_3(%arg0: i32, %arg1: i32) -> (i32, i32) {
    %c2_i32 = arith.constant 2 : i32
    %0 = arith.muli %arg0, %c2_i32 : i32
    %1 = arith.addi %0, %arg1 : i32
    %c3_i32 = arith.constant 3 : i32
    %2 = arith.minsi %1, %c3_i32 : i32
    %c0_i32 = arith.constant 0 : i32
    %c0_i32_0 = arith.constant 0 : i32
    return %2, %c0_i32 : i32, i32
  }
  func.func @transform_4(%arg0: i32, %arg1: i32) -> (i32, i32) {
    %c0_i32 = arith.constant 0 : i32
    %c0_i32_0 = arith.constant 0 : i32
    %c0_i32_1 = arith.constant 0 : i32
    return %c0_i32, %c0_i32_0 : i32, i32
  }
  func.func @transform_5(%arg0: i32, %arg1: i32) -> (i32, i32) {
    %c0_i32 = arith.constant 0 : i32
    %c0_i32_0 = arith.constant 0 : i32
    %c0_i32_1 = arith.constant 0 : i32
    return %c0_i32, %c0_i32_0 : i32, i32
  }
  func.func @transform_6(%arg0: i32, %arg1: i32) -> (i32, i32) {
    %c0_i32 = arith.constant 0 : i32
    %c0_i32_0 = arith.constant 0 : i32
    %c0_i32_1 = arith.constant 0 : i32
    return %c0_i32, %c0_i32_0 : i32, i32
  }
  func.func @transform_7(%arg0: i32, %arg1: i32) -> (i32, i32) {
    %c0_i32 = arith.constant 0 : i32
    %c0_i32_0 = arith.constant 0 : i32
    %c0_i32_1 = arith.constant 0 : i32
    return %c0_i32, %c0_i32_0 : i32, i32
  }
  func.func @transform_8(%arg0: i32, %arg1: i32) -> (i32, i32) {
    %c0_i32 = arith.constant 0 : i32
    %c0_i32_0 = arith.constant 0 : i32
    %c0_i32_1 = arith.constant 0 : i32
    return %c0_i32, %c0_i32_0 : i32, i32
  }
  func.func @transform_9(%arg0: i32, %arg1: i32) -> (i32, i32) {
    %c0_i32 = arith.constant 0 : i32
    %c0_i32_0 = arith.constant 0 : i32
    %c0_i32_1 = arith.constant 0 : i32
    return %c0_i32, %c0_i32_0 : i32, i32
  }
  func.func @transform_10(%arg0: i32, %arg1: i32) -> (i32, i32) {
    %c0_i32 = arith.constant 0 : i32
    %c0_i32_0 = arith.constant 0 : i32
    %c0_i32_1 = arith.constant 0 : i32
    return %c0_i32, %c0_i32_0 : i32, i32
  }
  func.func @transform_11(%arg0: i32, %arg1: i32) -> (i32, i32) {
    %c0_i32 = arith.constant 0 : i32
    %c0_i32_0 = arith.constant 0 : i32
    %c0_i32_1 = arith.constant 0 : i32
    return %c0_i32, %c0_i32_0 : i32, i32
  }
  func.func @transform_12(%arg0: i32, %arg1: i32) -> (i32, i32) {
    %c0_i32 = arith.constant 0 : i32
    %c0_i32_0 = arith.constant 0 : i32
    %c0_i32_1 = arith.constant 0 : i32
    return %c0_i32, %c0_i32_0 : i32, i32
  }
  func.func @transform_13(%arg0: i32, %arg1: i32) -> (i32, i32, i32) {
    %c0_i32 = arith.constant 0 : i32
    %c0_i32_0 = arith.constant 0 : i32
    %c0_i32_1 = arith.constant 0 : i32
    return %arg0, %c0_i32, %c0_i32_0 : i32, i32, i32
  }
  func.func @transform_14(%arg0: i32, %arg1: i32) -> (i32, i32, i32) {
    %c0_i32 = arith.constant 0 : i32
    %c0_i32_0 = arith.constant 0 : i32
    %c0_i32_1 = arith.constant 0 : i32
    return %arg0, %c0_i32, %c0_i32_0 : i32, i32, i32
  }
}

</mosaic_0001>

<bundles_post_ra>
// kernel: tpu_custom_call.1
= control target key start
LH: loop header
LB: loop body
LE: loop exit
PB: predicated region body
PF: predicated region fallthrough
CT: control target
= control target key end

     0   :  { %s2752_s0 = inlined_call_operand.vmem [shape: s32[3,1,128], index: 0, kind: input, shape index: {}]   ;;  %s2753_s1 = inlined_call_operand.vmem [shape: s32[4,1,256], index: 1, kind: input, shape index: {}]   ;;  %s2754_s2 = inlined_call_operand.vmem [shape: f32[384,16], index: 2, kind: input, shape index: {}]   ;;  %s2755_s3 = inlined_call_operand.vmem [shape: f32[1024,16], index: 3, kind: input, shape index: {}]   ;;  %s2756_s4 = inlined_call_operand.vmem [shape: f32[8,32], index: 4, kind: input, shape index: {}]   ;;  %s2757_s5 = inlined_call_operand.vmem [shape: f32[16,128], index: 5, kind: input, shape index: {}]   ;;  %s2758_s6 = inlined_call_operand.vmem [shape: f32[1,128], index: 6, kind: input, shape index: {}]   ;;  %s2759_s7 = inlined_call_operand.vmem [shape: f32[32,128], index: 7, kind: input, shape index: {}]   ;;  %s2760_s8 = inlined_call_operand.vmem [shape: f32[1,128], index: 8, kind: input, shape index: {}]   ;;  %s2761_s9 = inlined_call_operand.vmem [shape: f32[16,128], index: 9, kind: input, shape index: {}]   ;;  %s2762_s10 = inlined_call_operand.vmem [shape: f32[1,128], index: 10, kind: input, shape index: {}]   ;;  %s2763_s11 = inlined_call_operand.vmem [shape: f32[32,128], index: 11, kind: input, shape index: {}]   ;;  %s2764_s12 = inlined_call_operand.vmem [shape: f32[1,128], index: 12, kind: input, shape index: {}]   ;;  %s2765_s13 = inlined_call_operand.hbm [shape: f32[2,8,16], index: 13, kind: output, shape index: {0}]   ;;  %s2766_s14 = inlined_call_operand.hbm [shape: f32[2,8,16], index: 14, kind: output, shape index: {1}]  }
   0x1   :  { %2785 = sst [smem:[#allocation26_spill]] %s2762_s10 }
   0x2   :  { %2786 = sst [smem:[#allocation27_spill]] %s2765_s13 }
   0x3   :  { %2787 = sst [smem:[#allocation28_spill]] %s2766_s14 }
   0x4   :  { %20 = vsyncpa [#allocation7], 0 }
   0x5   :  { %22 = vsyncpa [#allocation7 + $0x1], 0 }
   0x6   :  { %23 = vsyncpa [#allocation9], 0 }
   0x7   :  { %25 = vsyncpa [#allocation9 + $0x1], 0  ;;  %s2373_s29 = smov 0   ;;  %s2375_s30 = smov 0  }
   0x8   :  { %s2377_s15 = smov 0   ;;  %s2379_s16 = smov 0  }
   0x9   :  { %s2381_s17 = smov 0   ;;  %s2383_s18 = smov 0  }
   0xa   :  { %s2385_s19 = smov 0   ;;  %s2387_s20 = smov 0  }
   0xb LB: > { %2788 = sst [smem:[#allocation12_spill]] %s2259_s29  ;;  %s1743_s21 = sadd.s32 4294967295, %s2287_s20   ;;  %s2287_s20 = sphi %s2387_s20, %s31_s20   ;;  %s2283_s19 = sphi %s2385_s19, %s2823_s19   ;;  %s2279_s18 = sphi %s2383_s18, %s2822_s18   ;;  %s2275_s17 = sphi %s2381_s17, %s2821_s17   ;;  %s2271_s16 = sphi %s2379_s16, %s2820_s16   ;;  %s2267_s15 = sphi %s2377_s15, %s2819_s15   ;;  %s2263_s30 = sphi %s2375_s30, %s2818_s30   ;;  %s2259_s29 = sphi %s2373_s29, %s2817_s29  }
   0xc   : > { %2789 = sst [smem:[#allocation13_spill]] %s2263_s30  ;;  %s1744_s22 = sadd.s32 4294967294, %s2287_s20  }
   0xd   : > { %2790 = sst [smem:[#allocation14_spill]] %s2267_s15  ;;  %s40_s23 = sadd.s32 1, %s2279_s18 }
   0xe   : > { %2791 = sst [smem:[#allocation15_spill]] %s2275_s17  ;;  %p41_p0 = scmp.ge.s32.totalorder %s40_s23, 2 }
   0xf   : > { %2792 = sst [smem:[#allocation16_spill]] %s2279_s18  ;;  %s43_s24 = sadd.s32 1, %s2283_s19 }
  0x10   : > { %2793 = sst [smem:[#allocation17_spill]] %s2283_s19  ;;  %p385_p1 = scmp.ne.s32.totalorder %s2267_s15, %s2263_s30 }
  0x11   : > { %2794 = sst [smem:[#allocation18_spill]] %s2287_s20  ;;  %p386_p2 = scmp.eq.s32.totalorder %s1743_s21, 3 }
  0x12   : > { %s2825_s23 = smov (%p41_p0, %s40_s23), 0  ;;  %s2827_s24 = smov (!%p41_p0, %s43_s24), %s2283_s19 }
  0x13   : > { %2795 = sst [smem:[#allocation19_spill]] %s2825_s23  ;;  %p2422_p3 = por %p386_p2, %p385_p1 }
  0x14   : > { %p391_p4 = scmp.ne.s32.totalorder %s2263_s30, %s2259_s29  ;;  %p45_p5 = scmp.ge.s32.totalorder %s2827_s24, 2 }
  0x15   : > { %s2796_s25 = scalar_select %p2422_p3, 1, 0 }
  0x16   : > { %p392_p6 = scmp.eq.s32.totalorder %s1744_s22, 3  ;;  %p1755_p7 = scmp.ge.s32.totalorder %s2287_s20, 1 }
  0x17   : > { %2797 = sst [smem:[#allocation20_spill]] %s2796_s25  ;;  %p526_p8 = scmp.lt.s32.totalorder %s2287_s20, 5 }
  0x18   : > { %s2829_s24 = smov (%p45_p5, %s2827_s24), 0  ;;  %p2432_p9 = por %p392_p6, %p391_p4 }
  0x19   : > { %2798 = sst [smem:[#allocation21_spill]] %s2829_s24  ;;  %p527_p10 = pnand %p1755_p7, %p526_p8 }
  0x1a   : > { %s2799_s26 = scalar_select %p2432_p9, 1, 0 }
  0x1b   : > { %s372_s27 = ssub.s32 %s2283_s19, %s2829_s24  ;;  %s375_s28 = sadd.s32 1, %s2267_s15 }
  0x1c   : > { %2800 = sst [smem:[#allocation22_spill]] %s2799_s26  ;;  %p373_p11 = scmp.eq.s32.totalorder %s372_s27, 0 }
  0x1d   : > { %530 = sbr.rel (%p527_p10) target bundleno = 1547 (0x60b), region = 72 }
  0x1e   : > { %s2440_s21 = scalar_select %p373_p11, %s2267_s15, %s375_s28  }
  0x20   : > { %2801 = sst [smem:[#allocation23_spill]] %s2440_s21 }
  0x22   : > { %s2443_s22 = sand.u32 1, %s2263_s30   ;;  %s1758_s23 = sshll.u32 %s2275_s17, 1 }
  0x23   : > { %2802 = sst [smem:[#allocation24_spill]] %s2443_s22  ;;  %s1756_s18 = sshll.u32 %s2443_s22, 3 }
  0x24   : > { %s2448_s29 = sadd.s32 %s2271_s16, %s1758_s23  ;;  %s2475_s30 = scalar_lea.vmem [#allocation6], %s1756_s18 }
  0x25   : > { %2803 = sst [smem:[#allocation25_spill]] %s2448_s29  ;;  %p607_p12 = scmp.lt.s32.totalorder %s2448_s29, 2 }
  0x26   : > { %p618_p13 = scmp.lt.s32.totalorder %s2448_s29, 3  ;;  %s2477_s14 = scalar_lea.vmem [#allocation8], %s1756_s18 }
  0x27   : > { %s608_s27 = scalar_select %p607_p12, %s2448_s29, 2 }
  0x28   : > { %s619_s28 = scalar_select %p618_p13, %s2448_s29, 3 }
  0x29   : > { %s2454_s24 = scalar_select %p607_p12, %s608_s27, 2 }
  0x2a   : > { %s621_s19 = scalar_select %p618_p13, %s619_s28, 3 }
  0x2b   : > { %s1768_s26 = sshll.u32 %s608_s27, 4  ;;  %s1771_s25 = sshll.u32 %s619_s28, 5 }
  0x2c   : > { %s1766_s20 = sshll.u32 %s621_s19, 1  ;;  %p633_p0 = scmp.lt.s32.totalorder %s1768_s26, 47 }
  0x2d   : > { %s2463_s13 = scalar_lea.vmem %s2753_s1, %s1766_s20  ;;  %p647_p1 = scmp.lt.s32.totalorder %s1771_s25, 127 }
  0x2e   : > { %s2831_s26 = smov (!%p633_p0, %s1768_s26), 47  ;;  %p1774_p2 = scmp.ne.s32.totalorder %s2271_s16, 0 }
  0x2f   : > { %s1769_s22 = sshll.u32 %s2831_s26, 3  ;;  %s2833_s25 = smov (!%p647_p1, %s1771_s25), 127 }
  0x30   : > { %s2468_s10 = scalar_lea.vmem %s2754_s2, %s1769_s22  ;;  %s1772_s15 = sshll.u32 %s2833_s25, 3 }
  0x31   : > { %s2473_s19 = scalar_lea.vmem %s2755_s3, %s1772_s15  ;;  %661 = sbr.rel (%p1774_p2) target bundleno = 454 (0x1c6), region = 76 }
  0x32   : > { %s2804_s16 = sld [smem:[#allocation26_spill]] (!%p1774_p2) }
  0x36   : > { %v669_v0 = vld [vmem:[%s2759_s7 + $0x18] sm:$0xff]  ;;  %v2289_v2 = vmov 0.0   ;;  %v668_v3 = vld [vmem:[%s2759_s7 + $0x10] sm:$0xff]  ;;  %v667_v5 = vld [vmem:[%s2759_s7 + $0x8] sm:$0xff]  ;;  %vm677_vm0 = vcmask 261120   ;;  %vm2290_vm1 = vmmov 0  }
  0x37   : > { %v754_v1 = vld [vmem:[%s2763_s11 + $0x18] sm:$0xff]  ;;  %1962 = vmatprep.subr.mxu0 %v2289_v2  ;;  %1973 = vmatprep.subr.mxu1 %v2289_v2  ;;  %v753_v4 = vld [vmem:[%s2763_s11 + $0x10] sm:$0xff]  ;;  %v752_v6 = vld [vmem:[%s2763_s11 + $0x8] sm:$0xff]  ;;  %vm662_vm2 = vcmask 130048   ;;  %vm988_vm3 = vcmask 7168  }
  0x38   : > { %1963 = vmatpush3.msra.mxu0 %v669_v0  ;;  %1974 = vmatpush3.msra.mxu1 %v754_v1  ;;  %v666_v7 = vld [vmem:[%s2759_s7] sm:$0xff]  ;;  %v833_v10 = vld [vmem:[%s2757_s5 + $0x8] sm:$0xff]  ;;  %663 = vst.msk [vmem:[%s2475_s30] sm:$0xff] %vm662_vm2, %v2289_v2  ;;  %664 = vst.msk [vmem:[%s2477_s14] sm:$0xff] %vm662_vm2, %v2289_v2 }
  0x39   : > { %1964 = vmatprep.subr.mxu0 %v2289_v2  ;;  %1975 = vmatprep.subr.mxu1 %v2289_v2  ;;  %v751_v8 = vld [vmem:[%s2763_s11] sm:$0xff]  ;;  %v906_v11 = vld [vmem:[%s2761_s9 + $0x8] sm:$0xff] }
  0x3a   : > { %1965 = vmatpush3.msra.mxu0 %v668_v3  ;;  %1976 = vmatpush3.msra.mxu1 %v753_v4  ;;  %v665_v9 = vld [vmem:[%s2756_s4] sm:$0xff] }
  0x3b   : > { %1966 = vmatprep.subr.mxu0 %v2289_v2  ;;  %1977 = vmatprep.subr.mxu1 %v2289_v2  ;;  %v832_v12 = vld [vmem:[%s2757_s5] sm:$0xff] }
  0x3c   : > { %1967 = vmatpush3.msra.mxu0 %v667_v5  ;;  %1978 = vmatpush3.msra.mxu1 %v752_v6  ;;  %v905_v13 = vld [vmem:[%s2761_s9] sm:$0xff] }
  0x3d   : > { %1968 = vmatprep.subr.mxu0 %v2289_v2  ;;  %1979 = vmatprep.subr.mxu1 %v2289_v2  ;;  %v1775_v14 = vld [vmem:[%s2760_s8] ss:$0 sm:$0xff] }
  0x3e   : > { %1969 = vmatpush3.msra.mxu0 %v666_v7  ;;  %1970 = vmatprep.mubr.msk.f32.mxu0 %vm2290_vm1, %v2289_v2  ;;  %v1777_v15 = vld [vmem:[%s2764_s12] ss:$0 sm:$0xff] }
  0x3f   : > { %1980 = vmatpush3.msra.mxu1 %v751_v8  ;;  %1981 = vmatprep.mubr.msk.f32.mxu1 %vm2290_vm1, %v2289_v2  ;;  %v1779_v18 = vld [vmem:[%s2758_s6] ss:$0 sm:$0xff] }
  0x40   : > { %1971 = vmatmul.mubr.msk.f32.vlgmr.msra.gmra.mxu0 %vm677_vm0, %v665_v9  ;;  %1982 = vmatmul.mubr.msk.f32.vlgmr.msra.gmra.mxu1 %vm677_vm0, %v665_v9  ;;  %v1780_v24 = vld [vmem:[%s2804_s16] ss:$0 sm:$0xff] }
  0x41   : > { %1984 = vmatprep.subr.mxu0 %v2289_v2  ;;  %1991 = vmatprep.subr.mxu1 %v2289_v2 }
  0x42   : > { %1985 = vmatpush3.xpose.msra.mxu0 %v833_v10  ;;  %1992 = vmatpush3.xpose.msra.mxu1 %v906_v11 }
  0x43   : > { %1986 = vmatprep.subr.mxu0 %v2289_v2  ;;  %1993 = vmatprep.subr.mxu1 %v2289_v2 }
  0x44   : > { %1988 = vmatprep.mubr.msk.f32.mxu0 %vm2290_vm1, %v2289_v2  ;;  %1995 = vmatprep.mubr.msk.f32.mxu1 %vm2290_vm1, %v2289_v2 }
  0x46   : > { %1987 = vmatpush3.xpose.msra.mxu0 %v832_v12  ;;  %1994 = vmatpush3.xpose.msra.mxu1 %v905_v13 }
 0x100   : > { %v747_v16 = vpop.f32.mrf.mxu0  ;;  %v828_v17 = vpop.f32.mrf.mxu1 }
 0x101   : > { %v748_v19 = vadd.f32 %v1775_v14, %v747_v16  ;;  %v829_v20 = vadd.f32 %v1777_v15, %v828_v17 }
 0x102   : > { %v1972_v21 = vpop.f32.mrf.mxu0  ;;  %v1983_v22 = vpop.f32.mrf.mxu1 }
 0x103   : > { %1989 = vmatmul.mubr.f32.vlgmr.msra.gmra.mxu0 %v748_v19  ;;  %1996 = vmatmul.mubr.f32.vlgmr.msra.gmra.mxu1 %v829_v20  ;;  %v985_v23 = vmul.f32 %v1779_v18, %v748_v19  ;;  %v997_v25 = vmul.f32 %v1780_v24, %v829_v20 }
 0x105   : > { %986 = vadd.xlane.f32.xlu0 %v985_v23 }
 0x109   : > { %998 = vadd.xlane.f32.xlu0 %v997_v25 }
 0x18e   : > { %v987_v26 = vpop.xlane.xlu0 %986 }
 0x18f   : > { %989 = vst.msk [vmem:[#allocation3] sm:$0xff] %vm988_vm3, %v987_v26 }
 0x192   : > { %v999_v27 = vpop.xlane.xlu0 %998 }
 0x193   : > { %1000 = vst.msk [vmem:[#allocation5] sm:$0xff] %vm988_vm3, %v999_v27 }
 0x1c3   : > { %v900_v28 = vpop.f32.mrf.mxu0  ;;  %v973_v29 = vpop.f32.mrf.mxu1 }
 0x1c4   : > { %904 = vst.msk [vmem:[#allocation2] sm:$0xff] %vm662_vm2, %v900_v28  ;;  %977 = vst.msk [vmem:[#allocation4] sm:$0xff] %vm662_vm2, %v973_v29 }
 0x1c5   : > { %v1990_v30 = vpop.f32.mrf.mxu0  ;;  %v1997_v31 = vpop.f32.mrf.mxu1 }
 0x1c6 PF: > { %s2805_s23 = sld [smem:[#allocation25_spill]] }
 0x1cc   : > { %p1781_p4 = scmp.ge.s32.totalorder %s2805_s23, 3 }
 0x1cd   : > { %s2806_s21 = scalar_lea.vmem (!%p1781_p4), %s2752_s0, %s2454_s24 }
 0x1ce   : > { %1004 = sbr.rel (%p1781_p4) target bundleno = 973 (0x3cd), region = 80 }
 0x1d3   : > { %v1020_v32 = vld [vmem:[%s2468_s10 + $0x78] sm:$0xff]  ;;  %vm1029_vm4 = vcmask 130048   ;;  %v2291_v33 = vmov 0.0   ;;  %vm2292_vm5 = vmmov 0   ;;  %v2293_v34 = vmov 0   ;;  %v1019_v35 = vld [vmem:[%s2468_s10 + $0x70] sm:$0xff] }
 0x1d4   : > { %1998 = vmatprep.subr.mxu0 %v2291_v33  ;;  %2030 = vmatprep.mubr.msk.f32.mxu0 %vm2292_vm5, %v2291_v33  ;;  %v1023_v36 = vld [vmem:[#allocation3] sm:$0xff]  ;;  %v1017_v38 = vld [vmem:[%s2468_s10 + $0x60] sm:$0xff]  ;;  %v1016_v39 = vld [vmem:[%s2468_s10 + $0x58] sm:$0xff]  ;;  %v1151_v52 = vlaneseq }
 0x1d5   : > { %1999 = vmatpush3.xpose.msk.msra.mxu0 %vm1029_vm4, %v1020_v32  ;;  %2151 = vset.pattern.permute.xlu0 %v2293_v34  ;;  %v1018_v37 = vld [vmem:[%s2468_s10 + $0x68] sm:$0xff]  ;;  %v1015_v40 = vld [vmem:[%s2468_s10 + $0x50] sm:$0xff]  ;;  %v1013_v42 = vld [vmem:[%s2468_s10 + $0x40] sm:$0xff] }
 0x1d6   : > { %2000 = vmatprep.subr.mxu0 %v2291_v33  ;;  %2033 = vmatprep.subr.mxu1 %v2291_v33  ;;  %v1014_v41 = vld [vmem:[%s2468_s10 + $0x48] sm:$0xff]  ;;  %v1012_v43 = vld [vmem:[%s2468_s10 + $0x38] sm:$0xff]  ;;  %v1011_v44 = vld [vmem:[%s2468_s10 + $0x30] sm:$0xff]  ;;  %v1152_v53 = vshrl.u32 %v1151_v52, 7 }
 0x1d7   : > { %2034 = vmatpush3.msra.mxu1 %v1020_v32  ;;  %2065 = vmatprep.mubr.msk.f32.mxu1 %vm2292_vm5, %v2291_v33  ;;  %v1010_v45 = vld [vmem:[%s2468_s10 + $0x28] sm:$0xff]  ;;  %v1009_v46 = vld [vmem:[%s2468_s10 + $0x20] sm:$0xff]  ;;  %v1008_v47 = vld [vmem:[%s2468_s10 + $0x18] sm:$0xff] }
 0x1d8   : > { %2035 = vmatprep.subr.mxu1 %v2291_v33  ;;  %1026 = vperm.xlu0 %2151, %v1023_v36   ;;  %v1007_v48 = vld [vmem:[%s2468_s10 + $0x10] sm:$0xff]  ;;  %v1006_v49 = vld [vmem:[%s2468_s10 + $0x8] sm:$0xff]  ;;  %v1005_v50 = vld [vmem:[%s2468_s10] sm:$0xff] }
 0x1d9   : > { %2001 = vmatpush3.xpose.msk.msra.mxu0 %vm1029_vm4, %v1019_v35  ;;  %2036 = vmatpush3.msra.mxu1 %v1019_v35  ;;  %v1022_v51 = vld [vmem:[#allocation2] sm:$0xff] }
 0x1da   : > { %2002 = vmatprep.subr.mxu0 %v2291_v33  ;;  %2037 = vmatprep.subr.mxu1 %v2291_v33  ;;  %v1799_v54 = vld [vmem:[%s2806_s21] ss:$0 sm:$0xff] }
 0x1db   : > { %2038 = vmatpush3.msra.mxu1 %v1018_v37  ;;  %vm1157_vm6 = vcmp.eq.s32.totalorder %v1152_v53, %v1799_v54  ;;  %v1173_v9 = vld [vmem:[%s2475_s30] sm:$0xff] }
 0x1dc   : > { %2039 = vmatprep.subr.mxu1 %v2291_v33  ;;  %v1800_v57 = vsel %vm1157_vm6, 1.0, %v2291_v33 }
 0x1dd   : > { %2003 = vmatpush3.xpose.msk.msra.mxu0 %vm1029_vm4, %v1018_v37  ;;  %2040 = vmatpush3.msra.mxu1 %v1017_v38 }
 0x1de   : > { %2004 = vmatprep.subr.mxu0 %v2291_v33  ;;  %2041 = vmatprep.subr.mxu1 %v2291_v33 }
 0x1df   : > { %2042 = vmatpush3.msra.mxu1 %v1016_v39 }
 0x1e0   : > { %2043 = vmatprep.subr.mxu1 %v2291_v33 }
 0x1e1   : > { %2005 = vmatpush3.xpose.msk.msra.mxu0 %vm1029_vm4, %v1017_v38  ;;  %2044 = vmatpush3.msra.mxu1 %v1015_v40 }
 0x1e2   : > { %2006 = vmatprep.subr.mxu0 %v2291_v33  ;;  %2045 = vmatprep.subr.mxu1 %v2291_v33 }
 0x1e3   : > { %2046 = vmatpush3.msra.mxu1 %v1014_v41 }
 0x1e4   : > { %2047 = vmatprep.subr.mxu1 %v2291_v33 }
 0x1e5   : > { %2007 = vmatpush3.xpose.msk.msra.mxu0 %vm1029_vm4, %v1016_v39  ;;  %2048 = vmatpush3.msra.mxu1 %v1013_v42 }
 0x1e6   : > { %2008 = vmatprep.subr.mxu0 %v2291_v33  ;;  %2049 = vmatprep.subr.mxu1 %v2291_v33 }
 0x1e7   : > { %2050 = vmatpush3.msra.mxu1 %v1012_v43 }
 0x1e8   : > { %2051 = vmatprep.subr.mxu1 %v2291_v33 }
 0x1e9   : > { %2009 = vmatpush3.xpose.msk.msra.mxu0 %vm1029_vm4, %v1015_v40  ;;  %2052 = vmatpush3.msra.mxu1 %v1011_v44 }
 0x1ea   : > { %2010 = vmatprep.subr.mxu0 %v2291_v33  ;;  %2053 = vmatprep.subr.mxu1 %v2291_v33 }
 0x1eb   : > { %2054 = vmatpush3.msra.mxu1 %v1010_v45 }
 0x1ec   : > { %2055 = vmatprep.subr.mxu1 %v2291_v33 }
 0x1ed   : > { %2011 = vmatpush3.xpose.msk.msra.mxu0 %vm1029_vm4, %v1014_v41  ;;  %2056 = vmatpush3.msra.mxu1 %v1009_v46 }
 0x1ee   : > { %2012 = vmatprep.subr.mxu0 %v2291_v33  ;;  %2057 = vmatprep.subr.mxu1 %v2291_v33 }
 0x1ef   : > { %2058 = vmatpush3.msra.mxu1 %v1008_v47 }
 0x1f0   : > { %2059 = vmatprep.subr.mxu1 %v2291_v33 }
 0x1f1   : > { %2013 = vmatpush3.xpose.msk.msra.mxu0 %vm1029_vm4, %v1013_v42  ;;  %2060 = vmatpush3.msra.mxu1 %v1007_v48 }
 0x1f2   : > { %2014 = vmatprep.subr.mxu0 %v2291_v33  ;;  %2061 = vmatprep.subr.mxu1 %v2291_v33 }
 0x1f3   : > { %2062 = vmatpush3.msra.mxu1 %v1006_v49 }
 0x1f4   : > { %2063 = vmatprep.subr.mxu1 %v2291_v33 }
 0x1f5   : > { %2015 = vmatpush3.xpose.msk.msra.mxu0 %vm1029_vm4, %v1012_v43  ;;  %2064 = vmatpush3.msra.mxu1 %v1005_v50 }
 0x1f6   : > { %2016 = vmatprep.subr.mxu0 %v2291_v33 }
 0x1f9   : > { %2017 = vmatpush3.xpose.msk.msra.mxu0 %vm1029_vm4, %v1011_v44 }
 0x1fa   : > { %2018 = vmatprep.subr.mxu0 %v2291_v33 }
 0x1fd   : > { %2019 = vmatpush3.xpose.msk.msra.mxu0 %vm1029_vm4, %v1010_v45 }
 0x1fe   : > { %2020 = vmatprep.subr.mxu0 %v2291_v33 }
 0x201   : > { %2021 = vmatpush3.xpose.msk.msra.mxu0 %vm1029_vm4, %v1009_v46 }
 0x202   : > { %2022 = vmatprep.subr.mxu0 %v2291_v33 }
 0x205   : > { %2023 = vmatpush3.xpose.msk.msra.mxu0 %vm1029_vm4, %v1008_v47 }
 0x206   : > { %2024 = vmatprep.subr.mxu0 %v2291_v33 }
 0x209   : > { %2025 = vmatpush3.xpose.msk.msra.mxu0 %vm1029_vm4, %v1007_v48 }
 0x20a   : > { %2026 = vmatprep.subr.mxu0 %v2291_v33 }
 0x20d   : > { %2027 = vmatpush3.xpose.msk.msra.mxu0 %vm1029_vm4, %v1006_v49 }
 0x20e   : > { %2028 = vmatprep.subr.mxu0 %v2291_v33 }
 0x211   : > { %2029 = vmatpush3.xpose.msk.msra.mxu0 %vm1029_vm4, %v1005_v50 }
 0x214   : > { %2031 = vmatmul.mubr.msk.f32.vlgmr.msra.gmra.mxu0 %vm1029_vm4, %v1022_v51 }
 0x253   : > { %v1027_v55 = vpop.permute.xlu0 %1026 }
 0x2d4   : > { %v1147_v56 = vpop.f32.mrf.mxu0 }
 0x2d5   : > { %v1148_v58 = vadd.f32 %v1147_v56, %v1027_v55 }
 0x2d6   : > { %v2032_v59 = vpop.f32.mrf.mxu0 }
 0x2d7   : > { %v1160_v60 = vmul.f32 %v1800_v57, %v1148_v58 }
 0x2d9   : > { %v1161_v61 = vrot.slane %v1160_v60, 4 }
 0x2db   : > { %v1162_v62 = vadd.f32 %v1161_v61, %v1160_v60 }
 0x2dd   : > { %v1163_v63 = vrot.slane %v1162_v62, 2 }
 0x2df   : > { %v1164_v0 = vadd.f32 %v1163_v63, %v1162_v62 }
 0x2e1   : > { %v1165_v1 = vrot.slane %v1164_v0, 1 }
 0x2e3   : > { %v1166_v2 = vadd.f32 %v1165_v1, %v1164_v0 }
 0x2e5   : > { %v1167_v3 = vsub.f32 0.0, %v1166_v2 }
 0x2e7   : > { %v1168_v4 = vmul.f32 1.442695, %v1167_v3 }
 0x2e9   : > { %2152 = vpow2.f32 %v1168_v4 }
 0x2f6   : > { %v2153_v5 = vpop.eup %2152 }
 0x2f7   : > { %v1170_v6 = vadd.f32 1.0, %v2153_v5 }
 0x2f9   : > { %2154 = vrcp.f32 %v1170_v6 }
 0x306   : > { %v2155_v7 = vpop.eup %2154 }
 0x307   : > { %v1172_v8 = vmul.f32 %v2155_v7, %v1800_v57 }
 0x309   : > { %2066 = vmatmul.mubr.f32.vlgmr.msra.gmra.mxu1 %v1172_v8 }
 0x3c9   : > { %v1240_v10 = vpop.f32.mrf.mxu1 }
 0x3ca   : > { %v1244_v11 = vadd.f32 %v1240_v10, %v1173_v9 }
 0x3cb   : > { %v2067_v12 = vpop.f32.mrf.mxu1 }
 0x3cc   : > { %1245 = vst.msk [vmem:[%s2475_s30] sm:$0xff] %vm1029_vm4, %v1244_v11 }
 0x3cd PF: > { %s2807_s24 = sld [smem:[#allocation25_spill]] }
 0x3d3   : > { %p1801_p5 = scmp.ge.s32.totalorder %s2807_s24, 4 }
 0x3d5   : > { %1249 = sbr.rel (%p1801_p5) target bundleno = 1499 (0x5db), region = 84 }
 0x3da   : > { %v1281_v13 = vld [vmem:[%s2473_s19 + $0xf8] sm:$0xff]  ;;  %vm1290_vm7 = vcmask 130048   ;;  %v1280_v15 = vld [vmem:[%s2473_s19 + $0xf0] sm:$0xff]  ;;  %v2294_v16 = vmov 0   ;;  %v1279_v18 = vld [vmem:[%s2473_s19 + $0xe8] sm:$0xff]  ;;  %v1461_v48 = vlaneseq  ;;  %v2295_v57 = vmov 0.0  }
 0x3db   : > { %v1265_v14 = vld [vmem:[%s2473_s19 + $0x78] sm:$0xff]  ;;  %1893 = vmatprep.subr.msk.mxu0 %vm1290_vm7, %v1281_v13  ;;  %2156 = vset.pattern.permute.xlu0 %v2294_v16  ;;  %v1264_v17 = vld [vmem:[%s2473_s19 + $0x70] sm:$0xff]  ;;  %v1263_v19 = vld [vmem:[%s2473_s19 + $0x68] sm:$0xff] }
 0x3dc   : > { %1894 = vmatpush3.xpose.msk.msra.mxu0 %vm1290_vm7, %v1265_v14  ;;  %1927 = vmatprep.subr.mxu1 %v1281_v13  ;;  %v1278_v20 = vld [vmem:[%s2473_s19 + $0xe0] sm:$0xff]  ;;  %v1277_v22 = vld [vmem:[%s2473_s19 + $0xd8] sm:$0xff]  ;;  %v2626_v23 = vld [vmem:[#allocation4] sm:$0xff]  ;;  %v1462_v49 = vshrl.u32 %v1461_v48, 7 }
 0x3dd   : > { %1895 = vmatprep.subr.msk.mxu0 %vm1290_vm7, %v1280_v15  ;;  %1928 = vmatpush3.msra.mxu1 %v1265_v14  ;;  %v1262_v21 = vld [vmem:[%s2473_s19 + $0x60] sm:$0xff]  ;;  %v1261_v24 = vld [vmem:[%s2473_s19 + $0x58] sm:$0xff]  ;;  %v1276_v26 = vld [vmem:[%s2473_s19 + $0xd0] sm:$0xff] }
 0x3de   : > { %1929 = vmatprep.subr.mxu1 %v1280_v15  ;;  %1925 = vmatprep.mubr.msk.f32.mxu0 %vm1290_vm7, %v2626_v23  ;;  %v1284_v25 = vld [vmem:[#allocation5] sm:$0xff]  ;;  %v1260_v27 = vld [vmem:[%s2473_s19 + $0x50] sm:$0xff]  ;;  %v1275_v28 = vld [vmem:[%s2473_s19 + $0xc8] sm:$0xff]  ;;  %v1465_v50 = vsub.s32 0, %v1462_v49  ;;  %v1469_v52 = vsub.s32 1, %v1462_v49 }
 0x3df   : > { %1930 = vmatpush3.msra.mxu1 %v1264_v17  ;;  %1287 = vperm.xlu0 %2156, %v1284_v25   ;;  %v1259_v29 = vld [vmem:[%s2473_s19 + $0x48] sm:$0xff]  ;;  %v1274_v30 = vld [vmem:[%s2473_s19 + $0xc0] sm:$0xff]  ;;  %v1273_v32 = vld [vmem:[%s2473_s19 + $0xb8] sm:$0xff] }
 0x3e0   : > { %1896 = vmatpush3.xpose.msk.msra.mxu0 %vm1290_vm7, %v1264_v17  ;;  %1931 = vmatprep.subr.mxu1 %v1279_v18  ;;  %v1258_v31 = vld [vmem:[%s2473_s19 + $0x40] sm:$0xff]  ;;  %v1257_v33 = vld [vmem:[%s2473_s19 + $0x38] sm:$0xff]  ;;  %v1272_v34 = vld [vmem:[%s2473_s19 + $0xb0] sm:$0xff] }
 0x3e1   : > { %1897 = vmatprep.subr.msk.mxu0 %vm1290_vm7, %v1279_v18  ;;  %1932 = vmatpush3.msra.mxu1 %v1263_v19  ;;  %v1256_v35 = vld [vmem:[%s2473_s19 + $0x30] sm:$0xff]  ;;  %v1271_v36 = vld [vmem:[%s2473_s19 + $0xa8] sm:$0xff]  ;;  %v1270_v38 = vld [vmem:[%s2473_s19 + $0xa0] sm:$0xff] }
 0x3e2   : > { %1933 = vmatprep.subr.mxu1 %v1278_v20  ;;  %v1255_v37 = vld [vmem:[%s2473_s19 + $0x28] sm:$0xff]  ;;  %v1254_v39 = vld [vmem:[%s2473_s19 + $0x20] sm:$0xff]  ;;  %v1269_v40 = vld [vmem:[%s2473_s19 + $0x98] sm:$0xff] }
 0x3e3   : > { %1934 = vmatpush3.msra.mxu1 %v1262_v21  ;;  %v1253_v41 = vld [vmem:[%s2473_s19 + $0x18] sm:$0xff]  ;;  %v1268_v42 = vld [vmem:[%s2473_s19 + $0x90] sm:$0xff]  ;;  %v1267_v44 = vld [vmem:[%s2473_s19 + $0x88] sm:$0xff] }
 0x3e4   : > { %1898 = vmatpush3.xpose.msk.msra.mxu0 %vm1290_vm7, %v1263_v19  ;;  %1935 = vmatprep.subr.mxu1 %v1277_v22  ;;  %v1252_v43 = vld [vmem:[%s2473_s19 + $0x10] sm:$0xff]  ;;  %v1251_v45 = vld [vmem:[%s2473_s19 + $0x8] sm:$0xff]  ;;  %v1266_v46 = vld [vmem:[%s2473_s19 + $0x80] sm:$0xff] }
 0x3e5   : > { %1899 = vmatprep.subr.msk.mxu0 %vm1290_vm7, %v1278_v20  ;;  %1936 = vmatpush3.msra.mxu1 %v1261_v24  ;;  %v1250_v47 = vld [vmem:[%s2473_s19] sm:$0xff] }
 0x3e6   : > { %1937 = vmatprep.subr.mxu1 %v1276_v26  ;;  %v1282_v51 = vld [vmem:[%s2463_s13] sm:$0x3] }
 0x3e7   : > { %1938 = vmatpush3.msra.mxu1 %v1260_v27  ;;  %v1466_v53 = vrot.slane %v1282_v51, %v1465_v50  ;;  %v1470_v54 = vrot.slane %v1282_v51, %v1469_v52 }
 0x3e8   : > { %1900 = vmatpush3.xpose.msk.msra.mxu0 %vm1290_vm7, %v1262_v21  ;;  %1939 = vmatprep.subr.mxu1 %v1275_v28 }
 0x3e9   : > { %1901 = vmatprep.subr.msk.mxu0 %vm1290_vm7, %v1277_v22  ;;  %1940 = vmatpush3.msra.mxu1 %v1259_v29  ;;  %vm1471_vm8 = vcmp.eq.s32.totalorder %v1462_v49, %v1466_v53  ;;  %vm1472_vm9 = vcmp.eq.s32.totalorder %v1462_v49, %v1470_v54 }
 0x3ea   : > { %1941 = vmatprep.subr.mxu1 %v1274_v30  ;;  %v1835_v58 = vsel %vm1471_vm8, 1.0, %v2295_v57  ;;  %v1836_v61 = vsel %vm1472_vm9, 1.0, %v2295_v57 }
 0x3eb   : > { %1942 = vmatpush3.msra.mxu1 %v1258_v31 }
 0x3ec   : > { %1902 = vmatpush3.xpose.msk.msra.mxu0 %vm1290_vm7, %v1261_v24  ;;  %1943 = vmatprep.subr.mxu1 %v1273_v32 }
 0x3ed   : > { %1903 = vmatprep.subr.msk.mxu0 %vm1290_vm7, %v1276_v26  ;;  %1944 = vmatpush3.msra.mxu1 %v1257_v33  ;;  %v1503_v26 = vld [vmem:[%s2477_s14] sm:$0xff] }
 0x3ee   : > { %1945 = vmatprep.subr.mxu1 %v1272_v34 }
 0x3ef   : > { %1946 = vmatpush3.msra.mxu1 %v1256_v35 }
 0x3f0   : > { %1904 = vmatpush3.xpose.msk.msra.mxu0 %vm1290_vm7, %v1260_v27  ;;  %1947 = vmatprep.subr.mxu1 %v1271_v36 }
 0x3f1   : > { %1905 = vmatprep.subr.msk.mxu0 %vm1290_vm7, %v1275_v28  ;;  %1948 = vmatpush3.msra.mxu1 %v1255_v37 }
 0x3f2   : > { %1949 = vmatprep.subr.mxu1 %v1270_v38 }
 0x3f3   : > { %1950 = vmatpush3.msra.mxu1 %v1254_v39 }
 0x3f4   : > { %1906 = vmatpush3.xpose.msk.msra.mxu0 %vm1290_vm7, %v1259_v29  ;;  %1951 = vmatprep.subr.mxu1 %v1269_v40 }
 0x3f5   : > { %1907 = vmatprep.subr.msk.mxu0 %vm1290_vm7, %v1274_v30  ;;  %1952 = vmatpush3.msra.mxu1 %v1253_v41 }
 0x3f6   : > { %1953 = vmatprep.subr.mxu1 %v1268_v42 }
 0x3f7   : > { %1954 = vmatpush3.msra.mxu1 %v1252_v43 }
 0x3f8   : > { %1908 = vmatpush3.xpose.msk.msra.mxu0 %vm1290_vm7, %v1258_v31  ;;  %1955 = vmatprep.subr.mxu1 %v1267_v44 }
 0x3f9   : > { %1909 = vmatprep.subr.msk.mxu0 %vm1290_vm7, %v1273_v32  ;;  %1956 = vmatpush3.msra.mxu1 %v1251_v45 }
 0x3fa   : > { %1957 = vmatprep.subr.mxu1 %v1266_v46 }
 0x3fb   : > { %1958 = vmatpush3.msra.mxu1 %v1250_v47 }
 0x3fc   : > { %1910 = vmatpush3.xpose.msk.msra.mxu0 %vm1290_vm7, %v1257_v33 }
 0x3fd   : > { %1911 = vmatprep.subr.msk.mxu0 %vm1290_vm7, %v1272_v34 }
 0x400   : > { %1912 = vmatpush3.xpose.msk.msra.mxu0 %vm1290_vm7, %v1256_v35 }
 0x401   : > { %1913 = vmatprep.subr.msk.mxu0 %vm1290_vm7, %v1271_v36 }
 0x404   : > { %1914 = vmatpush3.xpose.msk.msra.mxu0 %vm1290_vm7, %v1255_v37 }
 0x405   : > { %1915 = vmatprep.subr.msk.mxu0 %vm1290_vm7, %v1270_v38 }
 0x408   : > { %1916 = vmatpush3.xpose.msk.msra.mxu0 %vm1290_vm7, %v1254_v39 }
 0x409   : > { %1917 = vmatprep.subr.msk.mxu0 %vm1290_vm7, %v1269_v40 }
 0x40c   : > { %1918 = vmatpush3.xpose.msk.msra.mxu0 %vm1290_vm7, %v1253_v41 }
 0x40d   : > { %1919 = vmatprep.subr.msk.mxu0 %vm1290_vm7, %v1268_v42 }
 0x410   : > { %1920 = vmatpush3.xpose.msk.msra.mxu0 %vm1290_vm7, %v1252_v43 }
 0x411   : > { %1921 = vmatprep.subr.msk.mxu0 %vm1290_vm7, %v1267_v44 }
 0x414   : > { %1922 = vmatpush3.xpose.msk.msra.mxu0 %vm1290_vm7, %v1251_v45 }
 0x415   : > { %1923 = vmatprep.subr.msk.mxu0 %vm1290_vm7, %v1266_v46 }
 0x418   : > { %1924 = vmatpush3.xpose.msk.msra.mxu0 %vm1290_vm7, %v1250_v47 }
 0x41b   : > { %1926 = vmatmul.mubr.msk.f32.vlgmr.msra.gmra.mxu0 %vm1290_vm7, %v2626_v23 }
 0x45a   : > { %v1288_v55 = vpop.permute.xlu0 %1287 }
 0x4db   : > { %v1456_v56 = vpop.f32.mrf.mxu0 }
 0x4dc   : > { %v1457_v59 = vadd.f32 %v1456_v56, %v1288_v55 }
 0x4dd   : > { %v1458_v60 = vpop.f32.mrf.mxu0 }
 0x4de   : > { %v1459_v62 = vadd.f32 %v1458_v60, %v1288_v55  ;;  %v1477_v63 = vmul.f32 %v1835_v58, %v1457_v59 }
 0x4e0   : > { %v1478_v0 = vmul.f32 %v1836_v61, %v1459_v62  ;;  %v1479_v1 = vrot.slane %v1477_v63, 4 }
 0x4e2   : > { %v1480_v2 = vadd.f32 %v1479_v1, %v1477_v63  ;;  %v1485_v3 = vrot.slane %v1478_v0, 4 }
 0x4e4   : > { %v1481_v4 = vrot.slane %v1480_v2, 2  ;;  %v1486_v5 = vadd.f32 %v1485_v3, %v1478_v0 }
 0x4e6   : > { %v1482_v6 = vadd.f32 %v1481_v4, %v1480_v2  ;;  %v1487_v7 = vrot.slane %v1486_v5, 2 }
 0x4e8   : > { %v1483_v8 = vrot.slane %v1482_v6, 1  ;;  %v1488_v9 = vadd.f32 %v1487_v7, %v1486_v5 }
 0x4ea   : > { %v1484_v10 = vadd.f32 %v1483_v8, %v1482_v6  ;;  %v1489_v11 = vrot.slane %v1488_v9, 1 }
 0x4ec   : > { %v1490_v12 = vadd.f32 %v1489_v11, %v1488_v9  ;;  %v1491_v13 = vsub.f32 0.0, %v1484_v10 }
 0x4ee   : > { %v1492_v14 = vsub.f32 0.0, %v1490_v12  ;;  %v1493_v15 = vmul.f32 1.442695, %v1491_v13 }
 0x4f0   : > { %2157 = vpow2.f32 %v1493_v15  ;;  %v1495_v16 = vmul.f32 1.442695, %v1492_v14 }
 0x4f2   : > { %2159 = vpow2.f32 %v1495_v16 }
 0x4fd   : > { %v2158_v17 = vpop.eup %2157 }
 0x4fe   : > { %v1497_v18 = vadd.f32 1.0, %v2158_v17 }
 0x4ff   : > { %v2160_v19 = vpop.eup %2159 }
 0x500   : > { %v1498_v20 = vadd.f32 1.0, %v2160_v19  ;;  %2161 = vrcp.f32 %v1497_v18 }
 0x502   : > { %2163 = vrcp.f32 %v1498_v20 }
 0x50d   : > { %v2162_v21 = vpop.eup %2161 }
 0x50e   : > { %v1501_v24 = vmul.f32 %v2162_v21, %v1835_v58 }
 0x50f   : > { %v2164_v22 = vpop.eup %2163 }
 0x510   : > { %v1502_v23 = vmul.f32 %v2164_v22, %v1836_v61 }
 0x512   : > { %1568 = vmatprep.mubr.f32.mxu1 %v1502_v23 }
 0x513   : > { %1569 = vmatmul.mubr.f32.vlgmr.msra.gmra.mxu1 %v1501_v24 }
 0x5d3   : > { %v1959_v25 = vpop.f32.mrf.mxu1 }
 0x5d5   : > { %v1960_v27 = vpop.f32.mrf.mxu1 }
 0x5d6   : > { %v1961_v28 = vadd.f32 %v1960_v27, %v1959_v25 }
 0x5d8   : > { %v1574_v29 = vadd.f32 %v1961_v28, %v1503_v26 }
 0x5da   : > { %1575 = vst.msk [vmem:[%s2477_s14] sm:$0xff] %vm1290_vm7, %v1574_v29 }
 0x5db PF: > { %s2808_s13 = sld [smem:[#allocation15_spill]]  ;;  %s1595_s18 = sshll.u32 %s2475_s30, 4  ;;  %s1596_s18 = int_to_ptr.vmem [resolvable:$true] %s1595_s18 }
 0x5dc   : > { %s2809_s19 = sld [smem:[#allocation24_spill]]  ;;  %s2165_s16 = scalar_lea.vmem %s1596_s18, 128 }
 0x5dd   : > { %s2811_s17 = sld [smem:[#allocation27_spill]]  ;;  %p2166_p6 = scmp.ne.s32.totalorder %s1596_s18, %s2165_s16 }
 0x5de   : > { %s2296_s23 = smov [#allocation6]  }
 0x5df   : > { %p2167_p7 = pnand %p2166_p6, %p2422_p3  ;;  %s2169_s10 = sshll.u32 %s2296_s23, 4  ;;  %s2170_s10 = int_to_ptr.vmem [resolvable:$false] %s2169_s10 }
 0x5e0   : > { %s2171_s15 = scalar_lea.vmem %s2170_s10, 256  ;;  %p2172_p10 = scmp.lt.s32.totalorder %s1596_s18, %s2170_s10 }
 0x5e1   : > { %s1839_s20 = sshll.u32 %s2808_s13, 7  ;;  %p2168_p8 = pneg %p2167_p7 }
 0x5e2   : > { %s1577_s28 = scalar_lea.sflag [#allocation7], %s2809_s19  ;;  %p2173_p11 = scmp.lt.s32.totalorder %s2171_s15, %s2165_s16 }
 0x5e3   : > { %s2812_s25 = smov %s2811_s17  ;;  %s1593_s22 = scalar_lea.hbm %s2811_s17, %s1839_s20 }
 0x5e4   : > { %p2174_p12 = por %p2173_p11, %p2172_p10 }
 0x5e6   : > { %p2175_p13 = pnand %p2174_p12, %p2168_p8 }
 0x5e8   : > { %2178 = shalt.err (!%p2175_p13)
}
 0x5e9   : > { %s2179_s21 = scalar_lea.hbm %s1593_s22, 128  ;;  %s2183_s26 = scalar_lea.hbm %s2812_s25, 256 }
 0x5ea   : > { %p2180_p0 = scmp.ne.s32.totalorder %s1593_s22, %s2179_s21  ;;  %p2184_p4 = scmp.lt.s32.totalorder %s1593_s22, %s2812_s25 }
 0x5eb   : > { %p2185_p5 = scmp.lt.s32.totalorder %s2183_s26, %s2179_s21 }
 0x5ec   : > { %p2181_p1 = pnand %p2180_p0, %p2422_p3 }
 0x5ed   : > { %p2186_p6 = por %p2185_p5, %p2184_p4 }
 0x5ee   : > { %p2182_p2 = pneg %p2181_p1 }
 0x5f0   : > { %p2187_p7 = pnand %p2186_p6, %p2182_p2 }
 0x5f2   : > { %2190 = shalt.err (!%p2187_p7)
}
 0x5f3   : > { %2068 = dma.vmem_to_hbm [thread:$0]  (%p2422_p3), %s1596_s18, 128, %s1593_s22, %s1577_s28  }
 0x5f4   : > { %s2813_s10 = sld [smem:[#allocation28_spill]]  ;;  %s1608_s30 = sshll.u32 %s2477_s14, 4  ;;  %s1609_s30 = int_to_ptr.vmem [resolvable:$true] %s1608_s30 }
 0x5f5   : > { %s1582_s24 = scalar_lea.sflag [#allocation9], %s2809_s19  ;;  %s2191_s29 = scalar_lea.vmem %s1609_s30, 128 }
 0x5f6   : > { %p2192_p8 = scmp.ne.s32.totalorder %s1609_s30, %s2191_s29  ;;  %s2297_s21 = smov [#allocation8]  }
 0x5f7   : > { %s2195_s26 = sshll.u32 %s2297_s21, 4  ;;  %s2196_s26 = int_to_ptr.vmem [resolvable:$false] %s2195_s26 }
 0x5f8   : > { %p2193_p10 = pnand %p2192_p8, %p2422_p3  ;;  %s2197_s17 = scalar_lea.vmem %s2196_s26, 256 }
 0x5f9   : > { %p2198_p12 = scmp.lt.s32.totalorder %s1609_s30, %s2196_s26  ;;  %p2199_p13 = scmp.lt.s32.totalorder %s2197_s17, %s2191_s29 }
 0x5fa   : > { %s1606_s15 = scalar_lea.hbm %s2813_s10, %s1839_s20  ;;  %p2194_p11 = pneg %p2193_p10 }
 0x5fb   : > { %p2200_p0 = por %p2199_p13, %p2198_p12 }
 0x5fd   : > { %p2201_p1 = pnand %p2200_p0, %p2194_p11 }
 0x5ff   : > { %2204 = shalt.err (!%p2201_p1)
}
 0x600   : > { %s2205_s13 = scalar_lea.hbm %s1606_s15, 128  ;;  %s2209_s20 = scalar_lea.hbm %s2813_s10, 256 }
 0x601   : > { %p2206_p2 = scmp.ne.s32.totalorder %s1606_s15, %s2205_s13  ;;  %p2210_p6 = scmp.lt.s32.totalorder %s1606_s15, %s2813_s10 }
 0x602   : > { %p2211_p7 = scmp.lt.s32.totalorder %s2209_s20, %s2205_s13 }
 0x603   : > { %p2207_p4 = pnand %p2206_p2, %p2422_p3 }
 0x604   : > { %p2212_p8 = por %p2211_p7, %p2210_p6 }
 0x605   : > { %p2208_p5 = pneg %p2207_p4 }
 0x607   : > { %p2213_p10 = pnand %p2212_p8, %p2208_p5 }
 0x609   : > { %2216 = shalt.err (!%p2213_p10)
}
 0x60a   : > { %2069 = dma.vmem_to_hbm [thread:$0]  (%p2422_p3), %s1609_s30, 128, %s1606_s15, %s1582_s24  }
 0x60b PF: > { %s2814_s28 = sld [smem:[#allocation18_spill]] }
 0x60c   : > { %s2815_s16 = sld [smem:[#allocation12_spill]] }
 0x611   : > { %p2079_p11 = scmp.ge.s32.totalorder %s2814_s28, 2 }
 0x612   : > { %s1620_s29 = sand.u32 1, %s2815_s16  }
 0x613   : > { %p2073_p12 = pnand %p2079_p11, %p2432_p9  ;;  %s1621_s21 = scalar_lea.sflag [#allocation7], %s1620_s29 }
 0x615   : > { %p2074_p13 = pneg %p2073_p12 }
 0x617   : > { %2250 = dma.done.wait (%p2074_p13), %s1621_s21, 128  }
 0x618   : > { %2252 = vsyncadd (%p2074_p13), %s1621_s21, 4294967168  ;;  %s1630_s26 = scalar_lea.sflag [#allocation9], %s1620_s29 }
 0x619   : > { %2254 = dma.done.wait (%p2074_p13), %s1630_s26, 128  }
 0x61a   : > { %2256 = vsyncadd (%p2074_p13), %s1630_s26, 4294967168  ;;  %s31_s20 = sadd.s32 1, %s2814_s28   ;;  %s2817_s29 = sld [smem:[#allocation13_spill]] }
 0x61b   : > { %p28_p0 = scmp.ge.s32.totalorder %s31_s20, 6   ;;  %s2818_s30 = sld [smem:[#allocation14_spill]] }
 0x61c   : > { %s2819_s15 = sld [smem:[#allocation23_spill]] }
 0x61d   : > { %s2820_s16 = sld [smem:[#allocation16_spill]]  ;;  %30 = sbr.rel (!%p28_p0) target bundleno = 11 (0xb), region = 145 }
 0x61e   : > { %s2821_s17 = sld [smem:[#allocation17_spill]] }
 0x61f   : > { %s2822_s18 = sld [smem:[#allocation19_spill]] }
 0x620   : > { %s2823_s19 = sld [smem:[#allocation21_spill]] }
 0x622   :  { %1635 = vsyncpa [#allocation7], 1 }
 0x623   :  { %1637 = vsyncpa [#allocation7 + $0x1], 1 }
 0x624   :  { %1638 = vsyncpa [#allocation9], 1 }
 0x625   :  { %1640 = vsyncpa [#allocation9 + $0x1], 1 }

</bundles_post_ra>
